<compile_context>
chip_gen: v5e
topology: v5e:2x2
jax: 0.10.0
libtpu: 0.0.40
codegen_flags: <defaults>
</compile_context>

<pallas_src>
import numpy as np
import jax
import jax.numpy as jnp
from jax.experimental import pallas as pl
from jax.experimental.pallas import tpu as pltpu

NEG_INF = -1e30
LEAKY_SLOPE = 0.01  # F.leaky_relu default negative_slope


def _round_up(x, m):
    return (x + m - 1) // m * m


# --------------------------------------------------------------------------
# Stage 1: node projection  z = h @ W^T  and per-node attention scores
# --------------------------------------------------------------------------
def proj_kernel(h_ref, w_ref, asrc_ref, adst_ref, z_ref, ssrc_ref, sdst_ref):
    # MXU matmul: bf16 inputs, f32 accumulation.
    z = jnp.dot(h_ref[...], w_ref[...], preferred_element_type=jnp.float32)
    z_ref[...] = z.astype(jnp.bfloat16)
    # Per-node scores from the f32 accumulation (VPU mul + XLU reduce).
    ssrc_ref[...] = jnp.sum(z * asrc_ref[...], axis=-1, keepdims=True)
    sdst_ref[...] = jnp.sum(z * adst_ref[...], axis=-1, keepdims=True)


def _project(h_p, w_p, a_src, a_dst, tile_n):
    n_pad, din_pad = h_p.shape
    dout_pad = w_p.shape[1]
    return pl.pallas_call(
        proj_kernel,
        out_shape=(
            jax.ShapeDtypeStruct((n_pad, dout_pad), jnp.bfloat16),
            jax.ShapeDtypeStruct((n_pad, 1), jnp.float32),
            jax.ShapeDtypeStruct((n_pad, 1), jnp.float32),
        ),
        grid=(n_pad // tile_n,),
        in_specs=[
            pl.BlockSpec((tile_n, din_pad), lambda i: (i, 0)),
            pl.BlockSpec((din_pad, dout_pad), lambda i: (0, 0)),
            pl.BlockSpec((1, dout_pad), lambda i: (0, 0)),
            pl.BlockSpec((1, dout_pad), lambda i: (0, 0)),
        ],
        out_specs=(
            pl.BlockSpec((tile_n, dout_pad), lambda i: (i, 0)),
            pl.BlockSpec((tile_n, 1), lambda i: (i, 0)),
            pl.BlockSpec((tile_n, 1), lambda i: (i, 0)),
        ),
        compiler_params=pltpu.CompilerParams(
            dimension_semantics=("parallel",)),
    )(h_p, w_p, a_src, a_dst)


# --------------------------------------------------------------------------
# Stage 2: tiled masked softmax-aggregation with online softmax
# --------------------------------------------------------------------------
def attn_kernel(sdst_ref, ssrc_ref, adj_ref, z_ref, o_ref, m_sc, l_sc, acc_sc):
    s_step = pl.program_id(1)

    @pl.when(s_step == 0)
    def _():
        m_sc[...] = jnp.full_like(m_sc, NEG_INF)
        l_sc[...] = jnp.zeros_like(l_sc)
        acc_sc[...] = jnp.zeros_like(acc_sc)

    adj = adj_ref[...].astype(jnp.float32)                  # (TD, TS)
    # e[d, s] = leaky_relu(s_dst[d] + s_src[s]), masked to edges only.
    e = sdst_ref[...] + ssrc_ref[...]                       # (TD,1)+(1,TS)
    e = jnp.where(e > 0, e, LEAKY_SLOPE * e)
    e = jnp.where(adj > 0, e, NEG_INF)

    m_prev = m_sc[...]
    m_new = jnp.maximum(m_prev, jnp.max(e, axis=-1, keepdims=True))
    corr = jnp.exp(m_prev - m_new)
    p = jnp.exp(e - m_new) * adj                            # exact 0 off-edges
    l_sc[...] = corr * l_sc[...] + jnp.sum(p, axis=-1, keepdims=True)
    acc_sc[...] = corr * acc_sc[...] + jnp.dot(
        p.astype(jnp.bfloat16), z_ref[...],
        preferred_element_type=jnp.float32)
    m_sc[...] = m_new

    @pl.when(s_step == pl.num_programs(1) - 1)
    def _():
        # Guard zero in-degree rows (e.g. padding rows) -> denom == 0.
        denom = jnp.maximum(l_sc[...], 1e-20)
        o_ref[...] = acc_sc[...] * pl.reciprocal(denom, approx=True)


# --------------------------------------------------------------------------
# Wrapper: padding, dtype plumbing, tiling
# --------------------------------------------------------------------------
def gat_forward(h, fc_w, attn_w, adj):
    """h: (N, Din) f32; fc_w: (Dout, Din); attn_w: (1, 2*Dout);
    adj: (N, N) with adj[dst, src] = 1.0 iff edge src -> dst exists."""
    N, Din = h.shape
    Dout = fc_w.shape[0]

    # Tile sizes chosen to fit comfortably in v7x's 64 MiB VMEM (adj tile
    # 256x512 bf16 = 256 KiB per pipeline buffer); larger graphs scale via
    # the grid, small graphs collapse to a single (128,128) tile.
    ts = 512 if N >= 512 else 128        # src (lane) tile of adj
    td = 256 if N >= 256 else 128        # dst (sublane) tile of adj
    step = max(ts, td)
    n_pad = _round_up(N, step)
    din_pad = _round_up(Din, 128)
    dout_pad = _round_up(Dout, 128)      # lane-dense z / output

    # Pad + cast (layout plumbing only).
    h_p = jnp.zeros((n_pad, din_pad), jnp.bfloat16).at[:N, :Din].set(
        h.astype(jnp.bfloat16))
    w_t = jnp.zeros((din_pad, dout_pad), jnp.bfloat16).at[:Din, :Dout].set(
        fc_w.T.astype(jnp.bfloat16))
    a_src = jnp.zeros((1, dout_pad), jnp.float32).at[:, :Dout].set(
        attn_w[:, :Dout].astype(jnp.float32))
    a_dst = jnp.zeros((1, dout_pad), jnp.float32).at[:, :Dout].set(
        attn_w[:, Dout:].astype(jnp.float32))
    adj_p = jnp.zeros((n_pad, n_pad), jnp.bfloat16).at[:N, :N].set(
        adj.astype(jnp.bfloat16))

    # Stage 1: z (bf16) + per-node scores (f32), computed once.
    z_bf16, s_src, s_dst = _project(h_p, w_t, a_src, a_dst, td)
    s_src_row = s_src.T                                   # (1, n_pad), tiny op

    # Stage 2: tiled online-softmax aggregation.
    grid = (n_pad // td, n_pad // ts)
    out_p = pl.pallas_call(
        attn_kernel,
        out_shape=jax.ShapeDtypeStruct((n_pad, dout_pad), jnp.float32),
        grid=grid,
        in_specs=[
            pl.BlockSpec((td, 1), lambda d, s: (d, 0)),         # s_dst col
            pl.BlockSpec((1, ts), lambda d, s: (0, s)),         # s_src row
            pl.BlockSpec((td, ts), lambda d, s: (d, s)),        # adj tile
            pl.BlockSpec((ts, dout_pad), lambda d, s: (s, 0)),  # z tile
        ],
        out_specs=pl.BlockSpec((td, dout_pad), lambda d, s: (d, 0)),
        scratch_shapes=[
            pltpu.VMEM((td, 1), jnp.float32),          # running max m
            pltpu.VMEM((td, 1), jnp.float32),          # running denom l
            pltpu.VMEM((td, dout_pad), jnp.float32),   # accumulator
        ],
        compiler_params=pltpu.CompilerParams(
            dimension_semantics=("parallel", "arbitrary"),
            vmem_limit_bytes=32 * 1024 * 1024,
        ),
    )(s_dst, s_src_row, adj_p, z_bf16)

    # TODO(synk): for many-small-graph workloads, batch graphs (block-diagonal
    # adj or a leading batch grid axis) per pallas_call to amortize overhead.
    return out_p[:N, :Dout]


# --------------------------------------------------------------------------
# Pure-JAX f32 reference (matches the torch/DGL forward semantics)
# --------------------------------------------------------------------------
def reference(h, fc_w, attn_w, adj):
    Dout = fc_w.shape[0]
    z = h @ fc_w.T
    a_src = attn_w[:, :Dout]                 # (1, Dout) -> multiplies z[src]
    a_dst = attn_w[:, Dout:]                 # (1, Dout) -> multiplies z[dst]
    e = (z @ a_dst.T) + (z @ a_src.T).T      # e[dst, src]
    e = jnp.where(e > 0, e, LEAKY_SLOPE * e)
    e = jnp.where(adj > 0, e, NEG_INF)
    p = jnp.exp(e - jnp.max(e, axis=-1, keepdims=True)) * adj
    alpha = p / jnp.sum(p, axis=-1, keepdims=True)
    return alpha @ z


if __name__ == "__main__":
    N, in_dim, out_dim = 16, 32, 16

    key = jax.random.PRNGKey(0)
    k_h, k_w, k_a = jax.random.split(key, 3)

    # node features
    h = jax.random.normal(k_h, (N, in_dim), dtype=jnp.float32)

    # xavier_normal_ with gain = calculate_gain('relu') = sqrt(2)
    gain = float(np.sqrt(2.0))
    std_fc = gain * float(np.sqrt(2.0 / (in_dim + out_dim)))
    fc_w = std_fc * jax.random.normal(k_w, (out_dim, in_dim), dtype=jnp.float32)
    std_a = gain * float(np.sqrt(2.0 / (2 * out_dim + 1)))
    attn_w = std_a * jax.random.normal(k_a, (1, 2 * out_dim), dtype=jnp.float32)

    # deterministic graph: self-loops + ring (i -> i+1) + skip (i -> i+3)
    adj_np = np.zeros((N, N), dtype=np.float32)   # adj[dst, src]
    for s in range(N):
        adj_np[s, s] = 1.0
        adj_np[(s + 1) % N, s] = 1.0
        adj_np[(s + 3) % N, s] = 1.0
    adj = jnp.asarray(adj_np)

    out = gat_forward(h, fc_w, attn_w, adj)
    out = jax.block_until_ready(out)

    ref = reference(h, fc_w, attn_w, adj)
    max_err = float(jnp.max(jnp.abs(out - ref)))
    # bf16 MXU inputs + approx reciprocal -> loose tolerance vs f32 reference
    assert jnp.allclose(out, ref, atol=5e-2, rtol=5e-2), (
        f"mismatch vs reference (max abs err {max_err})")

    print("KERNEL_OK")
</pallas_src>

<mosaic_0001>
module attributes {stable_mosaic.version = 11 : i64} {
  func.func @proj_kernel(%arg0: i32, %arg1: memref<128x128xbf16, #tpu.memory_space<vmem>>, %arg2: memref<128x128xbf16, #tpu.memory_space<vmem>>, %arg3: memref<1x128xf32, #tpu.memory_space<vmem>>, %arg4: memref<1x128xf32, #tpu.memory_space<vmem>>, %arg5: memref<128x128xbf16, #tpu.memory_space<vmem>>, %arg6: memref<128x1xf32, #tpu.memory_space<vmem>>, %arg7: memref<128x1xf32, #tpu.memory_space<vmem>>) attributes {dimension_semantics = [#tpu.dimension_semantics<parallel>], iteration_bounds = array<i64: 1>, scalar_prefetch = 0 : i64, scratch_operands = 0 : i64, tpu.core_type = #tpu.core_type<tc>, window_params = [{transform_indices = @transform_0, window_bounds = array<i64: 128, 128>}, {pipeline_mode = #tpu.pipeline_mode<synchronous>, transform_indices = @transform_1, window_bounds = array<i64: 128, 128>}, {pipeline_mode = #tpu.pipeline_mode<synchronous>, transform_indices = @transform_2, window_bounds = array<i64: 1, 128>}, {pipeline_mode = #tpu.pipeline_mode<synchronous>, transform_indices = @transform_3, window_bounds = array<i64: 1, 128>}, {transform_indices = @transform_4, window_bounds = array<i64: 128, 128>}, {transform_indices = @transform_5, window_bounds = array<i64: 128, 1>}, {transform_indices = @transform_6, window_bounds = array<i64: 128, 1>}]} {
    %c0 = arith.constant 0 : index
    %c0_0 = arith.constant 0 : index
    %0 = vector.load %arg1[%c0, %c0_0] : memref<128x128xbf16, #tpu.memory_space<vmem>>, vector<128x128xbf16>
    %c0_1 = arith.constant 0 : index
    %c0_2 = arith.constant 0 : index
    %1 = vector.load %arg2[%c0_1, %c0_2] : memref<128x128xbf16, #tpu.memory_space<vmem>>, vector<128x128xbf16>
    %cst = arith.constant dense<0.000000e+00> : vector<128x128xf32>
    %2 = tpu.matmul %0, %1, %cst {dimension_numbers = #tpu.dot_dimension_numbers<[1], [0], [0], [1], [0, 0, 1, 1], [], []>} : vector<128x128xbf16>, vector<128x128xbf16>, vector<128x128xf32> -> vector<128x128xf32>
    %3 = arith.truncf %2 : vector<128x128xf32> to vector<128x128xbf16>
    %c0_3 = arith.constant 0 : index
    %c0_4 = arith.constant 0 : index
    %4 = vector.load %arg5[%c0_3, %c0_4] : memref<128x128xbf16, #tpu.memory_space<vmem>>, vector<128x128xbf16>
    tpu.vector_store %arg5[%c0_3, %c0_4], %3 {strides = array<i32>} : memref<128x128xbf16, #tpu.memory_space<vmem>>, vector<128x128xbf16>,
    %c0_5 = arith.constant 0 : index
    %c0_6 = arith.constant 0 : index
    %5 = vector.load %arg3[%c0_5, %c0_6] : memref<1x128xf32, #tpu.memory_space<vmem>>, vector<1x128xf32>
    %6 = vector.broadcast %5 : vector<1x128xf32> to vector<128x128xf32>
    %7 = arith.mulf %2, %6 : vector<128x128xf32>
    %cst_7 = arith.constant dense<0.000000e+00> : vector<128xf32>
    %8 = vector.multi_reduction <add>, %7, %cst_7 [1] : vector<128x128xf32> to vector<128xf32>
    %9 = vector.shape_cast %8 : vector<128xf32> to vector<128x1xf32>
    %c0_8 = arith.constant 0 : index
    %c0_9 = arith.constant 0 : index
    %10 = vector.load %arg6[%c0_8, %c0_9] : memref<128x1xf32, #tpu.memory_space<vmem>>, vector<128x1xf32>
    tpu.vector_store %arg6[%c0_8, %c0_9], %9 {strides = array<i32>} : memref<128x1xf32, #tpu.memory_space<vmem>>, vector<128x1xf32>,
    %c0_10 = arith.constant 0 : index
    %c0_11 = arith.constant 0 : index
    %11 = vector.load %arg4[%c0_10, %c0_11] : memref<1x128xf32, #tpu.memory_space<vmem>>, vector<1x128xf32>
    %12 = vector.broadcast %11 : vector<1x128xf32> to vector<128x128xf32>
    %13 = arith.mulf %2, %12 : vector<128x128xf32>
    %cst_12 = arith.constant dense<0.000000e+00> : vector<128xf32>
    %14 = vector.multi_reduction <add>, %13, %cst_12 [1] : vector<128x128xf32> to vector<128xf32>
    %15 = vector.shape_cast %14 : vector<128xf32> to vector<128x1xf32>
    %c0_13 = arith.constant 0 : index
    %c0_14 = arith.constant 0 : index
    %16 = vector.load %arg7[%c0_13, %c0_14] : memref<128x1xf32, #tpu.memory_space<vmem>>, vector<128x1xf32>
    tpu.vector_store %arg7[%c0_13, %c0_14], %15 {strides = array<i32>} : memref<128x1xf32, #tpu.memory_space<vmem>>, vector<128x1xf32>,
    return
  }
  func.func @transform_0(%arg0: i32) -> (i32, i32) {
    %c0_i32 = arith.constant 0 : i32
    %c0_i32_0 = arith.constant 0 : i32
    return %arg0, %c0_i32 : i32, i32
  }
  func.func @transform_1(%arg0: i32) -> (i32, i32) {
    %c0_i32 = arith.constant 0 : i32
    %c0_i32_0 = arith.constant 0 : i32
    %c0_i32_1 = arith.constant 0 : i32
    return %c0_i32, %c0_i32_0 : i32, i32
  }
  func.func @transform_2(%arg0: i32) -> (i32, i32) {
    %c0_i32 = arith.constant 0 : i32
    %c0_i32_0 = arith.constant 0 : i32
    %c0_i32_1 = arith.constant 0 : i32
    return %c0_i32, %c0_i32_0 : i32, i32
  }
  func.func @transform_3(%arg0: i32) -> (i32, i32) {
    %c0_i32 = arith.constant 0 : i32
    %c0_i32_0 = arith.constant 0 : i32
    %c0_i32_1 = arith.constant 0 : i32
    return %c0_i32, %c0_i32_0 : i32, i32
  }
  func.func @transform_4(%arg0: i32) -> (i32, i32) {
    %c0_i32 = arith.constant 0 : i32
    %c0_i32_0 = arith.constant 0 : i32
    return %arg0, %c0_i32 : i32, i32
  }
  func.func @transform_5(%arg0: i32) -> (i32, i32) {
    %c0_i32 = arith.constant 0 : i32
    %c0_i32_0 = arith.constant 0 : i32
    return %arg0, %c0_i32 : i32, i32
  }
  func.func @transform_6(%arg0: i32) -> (i32, i32) {
    %c0_i32 = arith.constant 0 : i32
    %c0_i32_0 = arith.constant 0 : i32
    return %arg0, %c0_i32 : i32, i32
  }
}

</mosaic_0001>

<bundles_post_ra>
// kernel: tpu_custom_call.1
= control target key start
LH: loop header
LB: loop body
LE: loop exit
PB: predicated region body
PF: predicated region fallthrough
CT: control target
= control target key end

     0   :  { %12 = vsyncpa [#allocation3], 0  ;;  %s896_s0 = inlined_call_operand.hbm [shape: bf16[128,128], index: 0, kind: input, shape index: {}]   ;;  %s897_s1 = inlined_call_operand.hbm [shape: bf16[128,128], index: 1, kind: input, shape index: {}]   ;;  %s898_s2 = inlined_call_operand.vmem [shape: f32[1,128], index: 2, kind: input, shape index: {}]   ;;  %s899_s3 = inlined_call_operand.vmem [shape: f32[1,128], index: 3, kind: input, shape index: {}]   ;;  %s900_s4 = inlined_call_operand.hbm [shape: bf16[128,128], index: 4, kind: output, shape index: {0}]   ;;  %s901_s5 = inlined_call_operand.vmem [shape: f32[128,1], index: 5, kind: output, shape index: {1}]   ;;  %s902_s6 = inlined_call_operand.vmem [shape: f32[128,1], index: 6, kind: output, shape index: {2}]  }
   0x1   :  { %13 = vsyncpa [#allocation6], 0 }
   0x2   :  { %14 = vsyncpa [#allocation4], 0  ;;  %s19_s23 = sshll.u32 %s896_s0, 4  ;;  %s663_s24 = smov [#allocation2]   ;;  %s20_s23 = int_to_ptr.hbm [resolvable:$true] %s19_s23 }
   0x3   :  { %s21_s25 = sshll.u32 %s663_s24, 4  ;;  %s32_s28 = sshll.u32 %s897_s1, 4  ;;  %s22_s25 = int_to_ptr.vmem [resolvable:$true] %s21_s25  ;;  %s33_s28 = int_to_ptr.hbm [resolvable:$true] %s32_s28 }
   0x4   :  { %s664_s29 = smov 64   ;;  %s665_s30 = smov 4  }
   0x5   :  { %27 = dma.hbm_to_vmem [thread:$0]  %s20_s23, 1024, %s22_s25, [#allocation3], %s664_s29, %s664_s29, %s665_s30  }
   0x6   :  { %s666_s7 = smov [#allocation5]  }
   0x7   :  { %s34_s8 = sshll.u32 %s666_s7, 4  ;;  %s35_s8 = int_to_ptr.vmem [resolvable:$true] %s34_s8 }
   0x8   :  { %40 = dma.hbm_to_vmem [thread:$0]  %s33_s28, 1024, %s35_s8, [#allocation6], %s664_s29, %s664_s29, %s665_s30  }
   0x9   :  { %657 = dma.done.wait [#allocation3], 1024  }
   0xa   :  { %658 = vsyncadd [#allocation3], 4294966272 }
   0xb   :  { %659 = dma.done.wait [#allocation6], 1024  }
   0xc   :  { %660 = vsyncadd [#allocation6], 4294966272  ;;  %v506_v0 = vld [vmem:[#allocation5 + $0x38] sm:$0xff]  ;;  %v505_v1 = vld [vmem:[#allocation5 + $0x30] sm:$0xff]  ;;  %s405_s13 = sshll.u32 %s900_s4, 4  ;;  %vm314_vm0 = vcmask 7168   ;;  %s406_s13 = int_to_ptr.hbm [resolvable:$true] %s405_s13 }
   0xd   :  { %181 = vmatpush.bf16.msra.mxu0 %v506_v0  ;;  %554 = vmatpush.bf16.msra.mxu1 %v506_v0  ;;  %v504_v2 = vld [vmem:[#allocation5 + $0x28] sm:$0xff]  ;;  %v503_v3 = vld [vmem:[#allocation5 + $0x20] sm:$0xff]  ;;  %v502_v4 = vld [vmem:[#allocation5 + $0x18] sm:$0xff] }
   0xe   :  { %556 = vmatpush.bf16.msra.mxu3 %v506_v0  ;;  %555 = vmatpush.bf16.msra.mxu2 %v506_v0  ;;  %v501_v5 = vld [vmem:[#allocation5 + $0x10] sm:$0xff]  ;;  %v500_v6 = vld [vmem:[#allocation5 + $0x8] sm:$0xff]  ;;  %v499_v7 = vld [vmem:[#allocation5] sm:$0xff] }
   0xf   :  { %v491_v8 = vld [vmem:[#allocation2] sm:$0xff]  ;;  %v493_v9 = vld [vmem:[#allocation2 + $0x10] sm:$0xff]  ;;  %v492_v12 = vld [vmem:[#allocation2 + $0x8] sm:$0xff] }
  0x10   :  { %v497_v10 = vld [vmem:[#allocation2 + $0x30] sm:$0xff]  ;;  %v495_v11 = vld [vmem:[#allocation2 + $0x20] sm:$0xff]  ;;  %v494_v13 = vld [vmem:[#allocation2 + $0x18] sm:$0xff] }
  0x11   :  { %182 = vmatpush.bf16.msra.mxu0 %v505_v1  ;;  %557 = vmatpush.bf16.msra.mxu1 %v505_v1  ;;  %v496_v14 = vld [vmem:[#allocation2 + $0x28] sm:$0xff]  ;;  %v498_v15 = vld [vmem:[#allocation2 + $0x38] sm:$0xff]  ;;  %v718_v16 = vld [vmem:[%s898_s2] ss:$0 sm:$0xff]  ;;  %s667_s2 = smov [#allocation7]  }
  0x12   :  { %559 = vmatpush.bf16.msra.mxu3 %v505_v1  ;;  %558 = vmatpush.bf16.msra.mxu2 %v505_v1  ;;  %v723_v17 = vld [vmem:[%s899_s3] ss:$0 sm:$0xff]  ;;  %s403_s3 = sshll.u32 %s667_s2, 4  ;;  %s404_s3 = int_to_ptr.vmem [resolvable:$true] %s403_s3 }
  0x15   :  { %183 = vmatpush.bf16.msra.mxu0 %v504_v2  ;;  %560 = vmatpush.bf16.msra.mxu1 %v504_v2 }
  0x16   :  { %562 = vmatpush.bf16.msra.mxu3 %v504_v2  ;;  %561 = vmatpush.bf16.msra.mxu2 %v504_v2 }
  0x19   :  { %184 = vmatpush.bf16.msra.mxu0 %v503_v3  ;;  %563 = vmatpush.bf16.msra.mxu1 %v503_v3 }
  0x1a   :  { %565 = vmatpush.bf16.msra.mxu3 %v503_v3  ;;  %564 = vmatpush.bf16.msra.mxu2 %v503_v3 }
  0x1d   :  { %185 = vmatpush.bf16.msra.mxu0 %v502_v4  ;;  %566 = vmatpush.bf16.msra.mxu1 %v502_v4 }
  0x1e   :  { %568 = vmatpush.bf16.msra.mxu3 %v502_v4  ;;  %567 = vmatpush.bf16.msra.mxu2 %v502_v4 }
  0x21   :  { %186 = vmatpush.bf16.msra.mxu0 %v501_v5  ;;  %569 = vmatpush.bf16.msra.mxu1 %v501_v5 }
  0x22   :  { %571 = vmatpush.bf16.msra.mxu3 %v501_v5  ;;  %570 = vmatpush.bf16.msra.mxu2 %v501_v5 }
  0x25   :  { %187 = vmatpush.bf16.msra.mxu0 %v500_v6  ;;  %572 = vmatpush.bf16.msra.mxu1 %v500_v6 }
  0x26   :  { %574 = vmatpush.bf16.msra.mxu3 %v500_v6  ;;  %573 = vmatpush.bf16.msra.mxu2 %v500_v6 }
  0x29   :  { %188 = vmatpush.bf16.msra.mxu0 %v499_v7  ;;  %575 = vmatpush.bf16.msra.mxu1 %v499_v7 }
  0x2a   :  { %577 = vmatpush.bf16.msra.mxu3 %v499_v7  ;;  %576 = vmatpush.bf16.msra.mxu2 %v499_v7 }
  0x2c   :  { %189 = vmatmul.bf16.vlgmr.msra.gmra.mxu0 %v491_v8  ;;  %199 = vmatmul.bf16.vlgmr.msra.gmra.mxu1 %v493_v9 }
  0x2d   :  { %219 = vmatmul.bf16.vlgmr.msra.gmra.mxu3 %v497_v10  ;;  %209 = vmatmul.bf16.vlgmr.msra.gmra.mxu2 %v495_v11 }
  0x3c   :  { %194 = vmatmul.bf16.gmra.mxu0 %v492_v12  ;;  %204 = vmatmul.bf16.gmra.mxu1 %v494_v13 }
  0x3d   :  { %214 = vmatmul.bf16.gmra.mxu2 %v496_v14  ;;  %224 = vmatmul.bf16.gmra.mxu3 %v498_v15 }
  0xa9   :  { %v190_v18 = vpop.f32.mrf.mxu0  ;;  %v200_v19 = vpop.f32.mrf.mxu1 }
  0xaa   :  { %v270_v20 = vmul.f32 %v718_v16, %v200_v19  ;;  %v335_v21 = vmul.f32 %v723_v17, %v190_v18  ;;  %v266_v22 = vmul.f32 %v718_v16, %v190_v18  ;;  %v339_v25 = vmul.f32 %v723_v17, %v200_v19 }
  0xac   :  { %290 = vadd.xlane.f32.xlu2 %v270_v20  ;;  %351 = vadd.xlane.f32.xlu1 %v335_v21 }
  0xad   :  { %282 = vadd.xlane.f32.xlu0 %v266_v22 }
  0xb0   :  { %v220_v23 = vpop.f32.mrf.mxu3  ;;  %v210_v24 = vpop.f32.mrf.mxu2 }
  0xb1   :  { %v192_v26 = vpop.f32.mrf.mxu0  ;;  %v202_v27 = vpop.f32.mrf.mxu1  ;;  %v347_v28 = vmul.f32 %v723_v17, %v220_v23  ;;  %v278_v29 = vmul.f32 %v718_v16, %v220_v23  ;;  %v274_v34 = vmul.f32 %v718_v16, %v210_v24  ;;  %v343_v37 = vmul.f32 %v723_v17, %v210_v24 }
  0xb2   :  { %v510_v30 = vpack.c.bf16 %v192_v26, %v190_v18  ;;  %v520_v31 = vpack.c.bf16 %v202_v27, %v200_v19  ;;  %v271_v45 = vmul.f32 %v718_v16, %v202_v27  ;;  %v267_v49 = vmul.f32 %v718_v16, %v192_v26 }
  0xb3   :  { %v336_v55 = vmul.f32 %v723_v17, %v192_v26  ;;  %v340_v56 = vmul.f32 %v723_v17, %v202_v27 }
  0xb4   :  { %511 = vst [vmem:[#allocation7] sm:$0xff] %v510_v30   ;;  %359 = vadd.xlane.f32.xlu2 %v339_v25  ;;  %375 = vadd.xlane.f32.xlu1 %v347_v28 }
  0xb5   :  { %548 = vst [vmem:[#allocation7 + $0x10] sm:$0xff] %v520_v31   ;;  %306 = vadd.xlane.f32.xlu0 %v278_v29 }
  0xb8   :  { %v731_v32 = vpop.f32.mrf.mxu3  ;;  %v212_v33 = vpop.f32.mrf.mxu2 }
  0xb9   :  { %v540_v35 = vpack.c.bf16 %v731_v32, %v220_v23  ;;  %v530_v36 = vpack.c.bf16 %v212_v33, %v210_v24  ;;  %v195_v38 = vpop.f32.mrf.mxu0  ;;  %v205_v39 = vpop.f32.mrf.mxu1  ;;  %v279_v40 = vmul.f32 %v718_v16, %v731_v32  ;;  %v344_v46 = vmul.f32 %v723_v17, %v212_v33 }
  0xba   :  { %v268_v50 = vmul.f32 %v718_v16, %v195_v38  ;;  %v341_v58 = vmul.f32 %v723_v17, %v205_v39  ;;  %v275_v59 = vmul.f32 %v718_v16, %v212_v33  ;;  %v272_v62 = vmul.f32 %v718_v16, %v205_v39 }
  0xbb   :  { %552 = vst [vmem:[#allocation7 + $0x30] sm:$0xff] %v540_v35   ;;  %v337_v1 = vmul.f32 %v723_v17, %v195_v38  ;;  %v348_v5 = vmul.f32 %v723_v17, %v731_v32 }
  0xbc   :  { %550 = vst [vmem:[#allocation7 + $0x20] sm:$0xff] %v530_v36   ;;  %298 = vadd.xlane.f32.xlu2 %v274_v34  ;;  %308 = vadd.xlane.f32.xlu1 %v279_v40 }
  0xbd   :  { %367 = vadd.xlane.f32.xlu0 %v343_v37 }
  0xc0   :  { %v215_v41 = vpop.f32.mrf.mxu2  ;;  %v225_v42 = vpop.f32.mrf.mxu3 }
  0xc1   :  { %v197_v43 = vpop.f32.mrf.mxu0  ;;  %v207_v44 = vpop.f32.mrf.mxu1  ;;  %v280_v57 = vmul.f32 %v718_v16, %v225_v42  ;;  %v345_v60 = vmul.f32 %v723_v17, %v215_v41  ;;  %v276_v61 = vmul.f32 %v718_v16, %v215_v41  ;;  %v349_v9 = vmul.f32 %v723_v17, %v225_v42 }
  0xc2   :  { %v515_v47 = vpack.c.bf16 %v197_v43, %v195_v38  ;;  %v525_v48 = vpack.c.bf16 %v207_v44, %v205_v39  ;;  %v342_v63 = vmul.f32 %v723_v17, %v207_v44  ;;  %v269_v0 = vmul.f32 %v718_v16, %v197_v43 }
  0xc3   :  { %v273_v3 = vmul.f32 %v718_v16, %v207_v44  ;;  %v338_v6 = vmul.f32 %v723_v17, %v197_v43 }
  0xc4   :  { %292 = vadd.xlane.f32.xlu2 %v271_v45  ;;  %369 = vadd.xlane.f32.xlu1 %v344_v46  ;;  %547 = vst [vmem:[#allocation7 + $0x8] sm:$0xff] %v515_v47  }
  0xc5   :  { %284 = vadd.xlane.f32.xlu0 %v267_v49  ;;  %549 = vst [vmem:[#allocation7 + $0x18] sm:$0xff] %v525_v48  }
  0xc8   :  { %v217_v51 = vpop.f32.mrf.mxu2  ;;  %v227_v52 = vpop.f32.mrf.mxu3 }
  0xc9   :  { %v535_v53 = vpack.c.bf16 %v217_v51, %v215_v41  ;;  %v545_v54 = vpack.c.bf16 %v227_v52, %v225_v42  ;;  %v277_v2 = vmul.f32 %v718_v16, %v217_v51  ;;  %v281_v4 = vmul.f32 %v718_v16, %v227_v52 }
  0xca   :  { %v346_v7 = vmul.f32 %v723_v17, %v217_v51  ;;  %v350_v8 = vmul.f32 %v723_v17, %v227_v52 }
  0xcb   :  { %551 = vst [vmem:[#allocation7 + $0x28] sm:$0xff] %v535_v53  }
  0xcc   :  { %353 = vadd.xlane.f32.xlu2 %v336_v55  ;;  %286 = vadd.xlane.f32.xlu1 %v268_v50  ;;  %553 = vst [vmem:[#allocation7 + $0x38] sm:$0xff] %v545_v54  }
  0xcd   :  { %361 = vadd.xlane.f32.xlu0 %v340_v56  ;;  %411 = dma.vmem_to_hbm [thread:$0]  %s404_s3, 1024, %s406_s13, [#allocation4], %s664_s29, %s664_s29, %s665_s30  }
  0xd4   :  { %310 = vadd.xlane.f32.xlu2 %v280_v57  ;;  %363 = vadd.xlane.f32.xlu1 %v341_v58 }
  0xd5   :  { %300 = vadd.xlane.f32.xlu0 %v275_v59 }
  0xdc   :  { %371 = vadd.xlane.f32.xlu2 %v345_v60  ;;  %302 = vadd.xlane.f32.xlu1 %v276_v61 }
  0xdd   :  { %294 = vadd.xlane.f32.xlu0 %v272_v62 }
  0xe4   :  { %365 = vadd.xlane.f32.xlu2 %v342_v63  ;;  %288 = vadd.xlane.f32.xlu1 %v269_v0 }
  0xe5   :  { %355 = vadd.xlane.f32.xlu0 %v337_v1 }
  0xec   :  { %304 = vadd.xlane.f32.xlu2 %v277_v2  ;;  %296 = vadd.xlane.f32.xlu1 %v273_v3 }
  0xed   :  { %312 = vadd.xlane.f32.xlu0 %v281_v4 }
  0xf4   :  { %377 = vadd.xlane.f32.xlu2 %v348_v5  ;;  %357 = vadd.xlane.f32.xlu1 %v338_v6 }
  0xf5   :  { %373 = vadd.xlane.f32.xlu0 %v346_v7 }
  0xfc   :  { %381 = vadd.xlane.f32.xlu1 %v350_v8 }
  0xfd   :  { %379 = vadd.xlane.f32.xlu0 %v349_v9 }
 0x11f   :  { %v291_v10 = vpop.xlane.xlu2 %290  ;;  %v352_v11 = vpop.xlane.xlu1 %351 }
 0x120   :  { %319 = vst.msk [vmem:[%s901_s5 + $0x20] sm:$0xff] %vm314_vm0, %v291_v10  ;;  %v283_v12 = vpop.xlane.xlu0 %282 }
 0x121   :  { %383 = vst.msk [vmem:[%s902_s6] sm:$0xff] %vm314_vm0, %v352_v11 }
 0x122   :  { %315 = vst.msk [vmem:[%s901_s5] sm:$0xff] %vm314_vm0, %v283_v12 }
 0x127   :  { %v360_v13 = vpop.xlane.xlu2 %359  ;;  %v376_v14 = vpop.xlane.xlu1 %375 }
 0x128   :  { %387 = vst.msk [vmem:[%s902_s6 + $0x20] sm:$0xff] %vm314_vm0, %v360_v13  ;;  %v307_v15 = vpop.xlane.xlu0 %306 }
 0x129   :  { %395 = vst.msk [vmem:[%s902_s6 + $0x60] sm:$0xff] %vm314_vm0, %v376_v14 }
 0x12a   :  { %327 = vst.msk [vmem:[%s901_s5 + $0x60] sm:$0xff] %vm314_vm0, %v307_v15 }
 0x12f   :  { %v299_v16 = vpop.xlane.xlu2 %298  ;;  %v309_v17 = vpop.xlane.xlu1 %308 }
 0x130   :  { %323 = vst.msk [vmem:[%s901_s5 + $0x40] sm:$0xff] %vm314_vm0, %v299_v16  ;;  %v368_v18 = vpop.xlane.xlu0 %367 }
 0x131   :  { %328 = vst.msk [vmem:[%s901_s5 + $0x68] sm:$0xff] %vm314_vm0, %v309_v17 }
 0x132   :  { %391 = vst.msk [vmem:[%s902_s6 + $0x40] sm:$0xff] %vm314_vm0, %v368_v18 }
 0x137   :  { %v293_v19 = vpop.xlane.xlu2 %292  ;;  %v370_v20 = vpop.xlane.xlu1 %369 }
 0x138   :  { %320 = vst.msk [vmem:[%s901_s5 + $0x28] sm:$0xff] %vm314_vm0, %v293_v19  ;;  %v285_v21 = vpop.xlane.xlu0 %284 }
 0x139   :  { %392 = vst.msk [vmem:[%s902_s6 + $0x48] sm:$0xff] %vm314_vm0, %v370_v20 }
 0x13a   :  { %316 = vst.msk [vmem:[%s901_s5 + $0x8] sm:$0xff] %vm314_vm0, %v285_v21 }
 0x13f   :  { %v354_v22 = vpop.xlane.xlu2 %353  ;;  %v287_v23 = vpop.xlane.xlu1 %286 }
 0x140   :  { %384 = vst.msk [vmem:[%s902_s6 + $0x8] sm:$0xff] %vm314_vm0, %v354_v22  ;;  %v362_v24 = vpop.xlane.xlu0 %361 }
 0x141   :  { %388 = vst.msk [vmem:[%s902_s6 + $0x28] sm:$0xff] %vm314_vm0, %v362_v24 }
 0x142   :  { %317 = vst.msk [vmem:[%s901_s5 + $0x10] sm:$0xff] %vm314_vm0, %v287_v23 }
 0x147   :  { %v311_v25 = vpop.xlane.xlu2 %310  ;;  %v364_v26 = vpop.xlane.xlu1 %363 }
 0x148   :  { %329 = vst.msk [vmem:[%s901_s5 + $0x70] sm:$0xff] %vm314_vm0, %v311_v25  ;;  %v301_v27 = vpop.xlane.xlu0 %300 }
 0x149   :  { %324 = vst.msk [vmem:[%s901_s5 + $0x48] sm:$0xff] %vm314_vm0, %v301_v27 }
 0x14a   :  { %389 = vst.msk [vmem:[%s902_s6 + $0x30] sm:$0xff] %vm314_vm0, %v364_v26 }
 0x14f   :  { %v372_v28 = vpop.xlane.xlu2 %371  ;;  %v303_v29 = vpop.xlane.xlu1 %302 }
 0x150   :  { %393 = vst.msk [vmem:[%s902_s6 + $0x50] sm:$0xff] %vm314_vm0, %v372_v28  ;;  %v295_v30 = vpop.xlane.xlu0 %294 }
 0x151   :  { %321 = vst.msk [vmem:[%s901_s5 + $0x30] sm:$0xff] %vm314_vm0, %v295_v30 }
 0x152   :  { %325 = vst.msk [vmem:[%s901_s5 + $0x50] sm:$0xff] %vm314_vm0, %v303_v29 }
 0x157   :  { %v366_v31 = vpop.xlane.xlu2 %365  ;;  %v289_v32 = vpop.xlane.xlu1 %288 }
 0x158   :  { %390 = vst.msk [vmem:[%s902_s6 + $0x38] sm:$0xff] %vm314_vm0, %v366_v31  ;;  %v356_v33 = vpop.xlane.xlu0 %355 }
 0x159   :  { %385 = vst.msk [vmem:[%s902_s6 + $0x10] sm:$0xff] %vm314_vm0, %v356_v33 }
 0x15a   :  { %318 = vst.msk [vmem:[%s901_s5 + $0x18] sm:$0xff] %vm314_vm0, %v289_v32 }
 0x15f   :  { %v305_v34 = vpop.xlane.xlu2 %304  ;;  %v297_v35 = vpop.xlane.xlu1 %296 }
 0x160   :  { %326 = vst.msk [vmem:[%s901_s5 + $0x58] sm:$0xff] %vm314_vm0, %v305_v34  ;;  %v313_v36 = vpop.xlane.xlu0 %312 }
 0x161   :  { %330 = vst.msk [vmem:[%s901_s5 + $0x78] sm:$0xff] %vm314_vm0, %v313_v36 }
 0x162   :  { %322 = vst.msk [vmem:[%s901_s5 + $0x38] sm:$0xff] %vm314_vm0, %v297_v35 }
 0x167   :  { %v378_v37 = vpop.xlane.xlu2 %377  ;;  %v358_v38 = vpop.xlane.xlu1 %357 }
 0x168   :  { %396 = vst.msk [vmem:[%s902_s6 + $0x68] sm:$0xff] %vm314_vm0, %v378_v37  ;;  %v374_v39 = vpop.xlane.xlu0 %373 }
 0x169   :  { %394 = vst.msk [vmem:[%s902_s6 + $0x58] sm:$0xff] %vm314_vm0, %v374_v39 }
 0x16a   :  { %386 = vst.msk [vmem:[%s902_s6 + $0x18] sm:$0xff] %vm314_vm0, %v358_v38 }
 0x16f   :  { %v382_v40 = vpop.xlane.xlu1 %381 }
 0x170   :  { %v380_v41 = vpop.xlane.xlu0 %379  ;;  %398 = vst.msk [vmem:[%s902_s6 + $0x78] sm:$0xff] %vm314_vm0, %v382_v40 }
 0x171   :  { %397 = vst.msk [vmem:[%s902_s6 + $0x70] sm:$0xff] %vm314_vm0, %v380_v41 }
 0x172   :  { %661 = dma.done.wait [#allocation4], 1024  }
 0x173   :  { %662 = vsyncadd [#allocation4], 4294966272 }
 0x174   :  { %424 = vsyncpa [#allocation3], 1 }
 0x175   :  { %425 = vsyncpa [#allocation6], 1 }
 0x176   :  { %426 = vsyncpa [#allocation4], 1 }

</bundles_post_ra>
